<compile_context>
chip_gen: v6e
topology: v6e:2x2x1
jax: 0.10.0
libtpu: 0.0.40
codegen_flags: <defaults>
</compile_context>

<pallas_src>
import jax
import jax.numpy as jnp
from jax.experimental import pallas as pl
from jax.experimental.pallas import tpu as pltpu


def _round_up(x, m):
    return (x + m - 1) // m * m


# ---------------- Path A: full-K tile, no accumulator (preferred) ----------------
def _fh_kernel_fullk(x_ref, w_ref, b_ref, o_ref):
    # x_ref: (M, nf) input dtype   w_ref: (nf, tn) bf16   b_ref: (1, tn) f32
    # o_ref: (M, tn) x.dtype
    x = x_ref[...].astype(w_ref.dtype)                     # cast in-kernel (no HBM copy)
    acc = jnp.dot(x, w_ref[...], preferred_element_type=jnp.float32)
    o_ref[...] = (acc + b_ref[...]).astype(o_ref.dtype)


# ---------------- Path B: K-tiled with f32 VMEM accumulator (fallback) ----------------
def _fh_kernel_ktiled(x_ref, w_ref, b_ref, o_ref, acc_ref):
    k = pl.program_id(1)

    @pl.when(k == 0)
    def _():
        acc_ref[...] = jnp.zeros_like(acc_ref)

    acc_ref[...] += jnp.dot(x_ref[...].astype(w_ref.dtype), w_ref[...],
                            preferred_element_type=jnp.float32)

    @pl.when(k == pl.num_programs(1) - 1)
    def _():
        o_ref[...] = (acc_ref[...] + b_ref[...]).astype(o_ref.dtype)


def flatten_head_forward(x, weight, bias, *, compute_dtype=jnp.bfloat16,
                         vmem_budget_bytes=12 * 1024 * 1024):
    """x: [B, n_vars, d_model, patch_num]
    weight: [target_window, nf] (PyTorch nn.Linear layout), bias: [target_window]
    returns: [B, n_vars, target_window] in x.dtype
    """
    B, n_vars, d_model, patch_num = x.shape
    nf = d_model * patch_num
    target_window = weight.shape[0]
    assert weight.shape == (target_window, nf)

    M = B * n_vars
    N_pad = _round_up(target_window, 128)

    # Parameter prep (in production hoist this out of the per-call hot path):
    # transpose so K sits on the RHS sublane axis, pad N to a lane multiple, cast bf16.
    w_t = jnp.pad(weight.T, ((0, 0), (0, N_pad - target_window))).astype(compute_dtype)
    b_p = jnp.pad(bias.astype(jnp.float32), (0, N_pad - target_window)).reshape(1, N_pad)

    # Activation: reshape only (free) — no pad, no cast, no extra HBM round-trip.
    x2d = x.reshape(M, nf)

    def fullk_vmem(tn):
        # double-buffered x + weight + bias + output tiles
        return 2 * (M * nf * x.dtype.itemsize
                    + nf * tn * 2
                    + tn * 4
                    + M * tn * x.dtype.itemsize)

    tn = min(N_pad, 256)
    use_fullk = fullk_vmem(tn) <= vmem_budget_bytes
    if not use_fullk and fullk_vmem(128) <= vmem_budget_bytes:
        tn, use_fullk = 128, True

    if use_fullk:
        grid = (N_pad // tn,)
        out = pl.pallas_call(
            _fh_kernel_fullk,
            out_shape=jax.ShapeDtypeStruct((M, N_pad), x.dtype),
            grid_spec=pltpu.PrefetchScalarGridSpec(
                num_scalar_prefetch=0,
                grid=grid,
                in_specs=[
                    pl.BlockSpec((M, nf), lambda j: (0, 0)),    # full x (block == array)
                    pl.BlockSpec((nf, tn), lambda j: (0, j)),   # weight [K, N] slab
                    pl.BlockSpec((1, tn), lambda j: (0, j)),    # bias
                ],
                out_specs=pl.BlockSpec((M, tn), lambda j: (0, j)),
            ),
            compiler_params=pltpu.CompilerParams(
                dimension_semantics=("parallel",)),
        )(x2d, w_t, b_p)
    else:
        # Very large nf: K-tiled accumulation (requires K padding to a 128 multiple).
        K128 = _round_up(nf, 128)
        tk = 128
        for cand in range(2048, 127, -128):
            if K128 % cand == 0:
                tk = cand
                break
        x_p = jnp.pad(x2d, ((0, 0), (0, K128 - nf)))
        w_p = jnp.pad(w_t, ((0, K128 - nf), (0, 0)))
        grid = (N_pad // tn, K128 // tk)
        out = pl.pallas_call(
            _fh_kernel_ktiled,
            out_shape=jax.ShapeDtypeStruct((M, N_pad), x.dtype),
            grid_spec=pltpu.PrefetchScalarGridSpec(
                num_scalar_prefetch=0,
                grid=grid,
                in_specs=[
                    pl.BlockSpec((M, tk), lambda j, k: (0, k)),
                    pl.BlockSpec((tk, tn), lambda j, k: (k, j)),
                    pl.BlockSpec((1, tn), lambda j, k: (0, j)),
                ],
                out_specs=pl.BlockSpec((M, tn), lambda j, k: (0, j)),
                scratch_shapes=[pltpu.VMEM((M, tn), jnp.float32)],
            ),
            compiler_params=pltpu.CompilerParams(
                dimension_semantics=("parallel", "arbitrary")),
        )(x_p, w_p, b_p)

    # Drop N padding; restore [B, n_vars, target_window].
    return out[:, :target_window].reshape(B, n_vars, target_window)


if __name__ == "__main__":
    # Small, module-consistent shapes
    B, n_vars, d_model, patch_num = 2, 4, 16, 8
    nf = d_model * patch_num            # 128
    target_window = 32

    key = jax.random.PRNGKey(0)
    kx, kw, kb = jax.random.split(key, 3)

    x = jax.random.normal(kx, (B, n_vars, d_model, patch_num), dtype=jnp.float32)
    bound = 1.0 / (nf ** 0.5)
    weight = jax.random.uniform(kw, (target_window, nf), jnp.float32, -bound, bound)
    bias = jax.random.uniform(kb, (target_window,), jnp.float32, -bound, bound)

    out = jax.block_until_ready(flatten_head_forward(x, weight, bias))

    # Reference: flatten + Linear (dropout p=0 is identity).
    x2d = x.reshape(B * n_vars, nf)
    # Exact-arithmetic reference (bf16 operands, f32 accumulation == MXU path).
    ref_bf16 = (x2d.astype(jnp.bfloat16).astype(jnp.float32)
                @ weight.astype(jnp.bfloat16).astype(jnp.float32).T) + bias
    ref_bf16 = ref_bf16.reshape(B, n_vars, target_window)
    # Full-precision reference (loose tolerance: bf16 operand rounding).
    ref_f32 = (x2d @ weight.T + bias).reshape(B, n_vars, target_window)

    assert out.shape == (B, n_vars, target_window)
    assert out.dtype == x.dtype
    assert jnp.allclose(out, ref_bf16, atol=2e-3, rtol=2e-3)
    assert jnp.allclose(out, ref_f32, atol=5e-2, rtol=5e-2)

    print("KERNEL_OK")
</pallas_src>

<mosaic_0001>
module attributes {stable_mosaic.version = 11 : i64} {
  func.func @_fh_kernel_fullk(%arg0: i32, %arg1: memref<8x128xf32, #tpu.memory_space<vmem>>, %arg2: memref<128x128xbf16, #tpu.memory_space<vmem>>, %arg3: memref<1x128xf32, #tpu.memory_space<vmem>>, %arg4: memref<8x128xf32, #tpu.memory_space<vmem>>) attributes {dimension_semantics = [#tpu.dimension_semantics<parallel>], iteration_bounds = array<i64: 1>, scalar_prefetch = 0 : i64, scratch_operands = 0 : i64, tpu.core_type = #tpu.core_type<tc>, window_params = [{pipeline_mode = #tpu.pipeline_mode<synchronous>, transform_indices = @transform_0, window_bounds = array<i64: 8, 128>}, {transform_indices = @transform_1, window_bounds = array<i64: 128, 128>}, {transform_indices = @transform_2, window_bounds = array<i64: 1, 128>}, {transform_indices = @transform_3, window_bounds = array<i64: 8, 128>}]} {
    %c0 = arith.constant 0 : index
    %c0_0 = arith.constant 0 : index
    %0 = vector.load %arg1[%c0, %c0_0] : memref<8x128xf32, #tpu.memory_space<vmem>>, vector<8x128xf32>
    %1 = arith.truncf %0 : vector<8x128xf32> to vector<8x128xbf16>
    %c0_1 = arith.constant 0 : index
    %c0_2 = arith.constant 0 : index
    %2 = vector.load %arg2[%c0_1, %c0_2] : memref<128x128xbf16, #tpu.memory_space<vmem>>, vector<128x128xbf16>
    %cst = arith.constant dense<0.000000e+00> : vector<8x128xf32>
    %3 = tpu.matmul %1, %2, %cst {dimension_numbers = #tpu.dot_dimension_numbers<[1], [0], [0], [1], [0, 0, 1, 1], [], []>} : vector<8x128xbf16>, vector<128x128xbf16>, vector<8x128xf32> -> vector<8x128xf32>
    %c0_3 = arith.constant 0 : index
    %c0_4 = arith.constant 0 : index
    %4 = vector.load %arg3[%c0_3, %c0_4] : memref<1x128xf32, #tpu.memory_space<vmem>>, vector<1x128xf32>
    %5 = vector.broadcast %4 : vector<1x128xf32> to vector<8x128xf32>
    %6 = arith.addf %3, %5 : vector<8x128xf32>
    %c0_5 = arith.constant 0 : index
    %c0_6 = arith.constant 0 : index
    %7 = vector.load %arg4[%c0_5, %c0_6] : memref<8x128xf32, #tpu.memory_space<vmem>>, vector<8x128xf32>
    tpu.vector_store %arg4[%c0_5, %c0_6], %6 {strides = array<i32>} : memref<8x128xf32, #tpu.memory_space<vmem>>, vector<8x128xf32>,
    return
  }
  func.func @transform_0(%arg0: i32) -> (i32, i32) {
    %c0_i32 = arith.constant 0 : i32
    %c0_i32_0 = arith.constant 0 : i32
    %c0_i32_1 = arith.constant 0 : i32
    return %c0_i32, %c0_i32_0 : i32, i32
  }
  func.func @transform_1(%arg0: i32) -> (i32, i32) {
    %c0_i32 = arith.constant 0 : i32
    %c0_i32_0 = arith.constant 0 : i32
    return %c0_i32, %arg0 : i32, i32
  }
  func.func @transform_2(%arg0: i32) -> (i32, i32) {
    %c0_i32 = arith.constant 0 : i32
    %c0_i32_0 = arith.constant 0 : i32
    return %c0_i32, %arg0 : i32, i32
  }
  func.func @transform_3(%arg0: i32) -> (i32, i32) {
    %c0_i32 = arith.constant 0 : i32
    %c0_i32_0 = arith.constant 0 : i32
    return %c0_i32, %arg0 : i32, i32
  }
}

</mosaic_0001>

<bundles_post_ra>
// kernel: tpu_custom_call.1
= control target key start
LH: loop header
LB: loop body
LE: loop exit
PB: predicated region body
PF: predicated region fallthrough
CT: control target
= control target key end

     0   :  { %8 = vsyncpa [#allocation3], 0  ;;  %s330_s0 = inlined_call_operand.hbm [shape: f32[8,128], index: 0, kind: input, shape index: {}]   ;;  %s331_s1 = inlined_call_operand.hbm [shape: bf16[128,128], index: 1, kind: input, shape index: {}]   ;;  %s332_s2 = inlined_call_operand.vmem [shape: f32[1,128], index: 2, kind: input, shape index: {}]   ;;  %s333_s3 = inlined_call_operand.hbm [shape: f32[8,128], index: 3, kind: output, shape index: {}]  }
   0x1   :  { %9 = vsyncpa [#allocation6], 0 }
   0x2   :  { %10 = vsyncpa [#allocation4], 0  ;;  %s291_s12 = smov [#allocation2]   ;;  %s292_s14 = smov [#allocation5]  }
   0x3   :  { %s17_s13 = sshll.u32 %s291_s12, 4  ;;  %s26_s15 = sshll.u32 %s292_s14, 4  ;;  %s18_s13 = int_to_ptr.vmem [resolvable:$true] %s17_s13  ;;  %s27_s15 = int_to_ptr.vmem [resolvable:$true] %s26_s15 }
   0x4   :  { %s233_s16 = scalar_lea.vmem %s18_s13, 128  ;;  %p238_p1 = scmp.lt.s32.totalorder %s18_s13, %s18_s13 }
   0x5   :  { %p234_p0 = scmp.ne.s32.totalorder %s18_s13, %s233_s16  ;;  %p239_p2 = scmp.lt.s32.totalorder %s233_s16, %s233_s16 }
   0x7   :  { %p240_p3 = por %p239_p2, %p238_p1 }
   0x9   :  { %p241_p4 = pnand %p240_p3, %p234_p0 }
   0xb   :  { %244 = shalt.err (!%p241_p4)
}
   0xc   :  { %20 = dma.hbm_to_vmem [thread:$0]  %s330_s0, 128, %s18_s13, [#allocation3]  }
   0xd   :  { %s253_s19 = scalar_lea.vmem %s27_s15, 1024  ;;  %p258_p6 = scmp.lt.s32.totalorder %s27_s15, %s27_s15 }
   0xe   :  { %p254_p5 = scmp.ne.s32.totalorder %s27_s15, %s253_s19  ;;  %p259_p7 = scmp.lt.s32.totalorder %s253_s19, %s253_s19 }
  0x10   :  { %p260_p8 = por %p259_p7, %p258_p6 }
  0x12   :  { %p261_p9 = pnand %p260_p8, %p254_p5 }
  0x14   :  { %264 = shalt.err (!%p261_p9)
}
  0x15   :  { %s293_s20 = smov 64   ;;  %s294_s21 = smov 4  }
  0x16   :  { %32 = dma.hbm_to_vmem [thread:$0]  %s331_s1, 1024, %s27_s15, [#allocation6], %s293_s20, %s293_s20, %s294_s21  }
  0x17   :  { %285 = dma.done.wait [#allocation3], 128  }
  0x18   :  { %286 = vsyncadd [#allocation3], 4294967168 }
  0x19   :  { %287 = dma.done.wait [#allocation6], 1024  }
  0x1a   :  { %288 = vsyncadd [#allocation6], 4294966272  ;;  %v295_v0 = vmov 0.0   ;;  %vm296_vm0 = vmmov 0   ;;  %v217_v1 = vld [vmem:[#allocation5 + $0x38] sm:$0xff]   ;;  %v218_v2 = vld [vmem:[#allocation5 + $0x30] sm:$0xff]  }
  0x1b   :  { %190 = vmatprep.subr.bf16.mxu0 %v295_v0  ;;  %206 = vmatprep.mubr.msk.bf16.mxu0 %vm296_vm0, %v295_v0  ;;  %v219_v3 = vld [vmem:[#allocation5 + $0x28] sm:$0xff]   ;;  %v220_v4 = vld [vmem:[#allocation5 + $0x20] sm:$0xff]   ;;  %v221_v5 = vld [vmem:[#allocation5 + $0x18] sm:$0xff]   ;;  %s297_s24 = smov [#allocation7]  }
  0x1c   :  { %191 = vmatpush3.bf16.msra.mxu0 %v217_v1  ;;  %v222_v6 = vld [vmem:[#allocation5 + $0x10] sm:$0xff]   ;;  %v223_v7 = vld [vmem:[#allocation5 + $0x8] sm:$0xff]   ;;  %v224_v8 = vld [vmem:[#allocation5] sm:$0xff]   ;;  %s162_s25 = sshll.u32 %s297_s24, 4  ;;  %s163_s25 = int_to_ptr.vmem [resolvable:$true] %s162_s25 }
  0x1d   :  { %192 = vmatprep.subr.bf16.mxu0 %v295_v0  ;;  %v42_v9 = vld [vmem:[#allocation2] sm:$0xff]  ;;  %s265_s26 = scalar_lea.vmem %s163_s25, 128  ;;  %p270_p11 = scmp.lt.s32.totalorder %s163_s25, %s163_s25 }
  0x1e   :  { %v43_v10 = vpack.c.bf16 %v42_v9, %v42_v9  ;;  %v172_v11 = vld [vmem:[%s332_s2] ss:$0 sm:$0xff]  ;;  %p266_p10 = scmp.ne.s32.totalorder %s163_s25, %s265_s26  ;;  %p271_p12 = scmp.lt.s32.totalorder %s265_s26, %s265_s26 }
  0x20   :  { %193 = vmatpush3.bf16.msra.mxu0 %v218_v2  ;;  %p272_p13 = por %p271_p12, %p270_p11 }
  0x21   :  { %194 = vmatprep.subr.bf16.mxu0 %v295_v0 }
  0x22   :  { %p273_p0 = pnand %p272_p13, %p266_p10 }
  0x24   :  { %195 = vmatpush3.bf16.msra.mxu0 %v219_v3 }
  0x25   :  { %196 = vmatprep.subr.bf16.mxu0 %v295_v0 }
  0x28   :  { %197 = vmatpush3.bf16.msra.mxu0 %v220_v4 }
  0x29   :  { %198 = vmatprep.subr.bf16.mxu0 %v295_v0 }
  0x2c   :  { %199 = vmatpush3.bf16.msra.mxu0 %v221_v5 }
  0x2d   :  { %200 = vmatprep.subr.bf16.mxu0 %v295_v0 }
  0x30   :  { %201 = vmatpush3.bf16.msra.mxu0 %v222_v6 }
  0x31   :  { %202 = vmatprep.subr.bf16.mxu0 %v295_v0 }
  0x34   :  { %203 = vmatpush3.bf16.msra.mxu0 %v223_v7 }
  0x35   :  { %204 = vmatprep.subr.bf16.mxu0 %v295_v0 }
  0x38   :  { %205 = vmatpush3.bf16.msra.mxu0 %v224_v8 }
  0x3b   :  { %207 = vmatmul.mubr.bf16.vlgmr.msra.gmra.mxu0 %v43_v10 }
  0xfb   :  { %v149_v12 = vpop.f32.mrf.mxu0 }
  0xfc   :  { %v150_v13 = vadd.f32 %v172_v11, %v149_v12 }
  0xfd   :  { %v208_v14 = vpop.f32.mrf.mxu0 }
  0xfe   :  { %155 = vst [vmem:[#allocation7] sm:$0xff] %v150_v13 }
  0xff   :  { %v152_v15 = vpop.f32.mrf.mxu0 }
 0x100   :  { %276 = shalt.err (!%p273_p0)
}
 0x101   :  { %165 = dma.vmem_to_hbm [thread:$0]  %s163_s25, 128, %s333_s3, [#allocation4]   ;;  %v209_v16 = vpop.f32.mrf.mxu0 }
 0x102   :  { %289 = dma.done.wait [#allocation4], 128  }
 0x103   :  { %290 = vsyncadd [#allocation4], 4294967168 }
 0x104   :  { %169 = vsyncpa [#allocation3], 1 }
 0x105   :  { %170 = vsyncpa [#allocation6], 1 }
 0x106   :  { %171 = vsyncpa [#allocation4], 1 }

</bundles_post_ra>
